<compile_context>
chip_gen: v6e
topology: v6e:2x2x1
jax: 0.10.0
libtpu: 0.0.40
codegen_flags: <defaults>
</compile_context>

<pallas_src>
import jax
import jax.numpy as jnp
from jax.experimental import pallas as pl
from jax.experimental.pallas import tpu as pltpu


_LANE_W = 1024   # lane-dense last dim: large multiple of 128 -> unmasked vst
_TILE_R = 256    # 256 x 1024 f32 = 1 MiB per input tile (near HBM-roofline
                 # sweet spot); double-buffered in+out stays well under the
                 # scoped-VMEM limits of v5e (16 MiB) / v6e (32) / v7x (64 phys)


def _posit_kernel(x_ref, o_ref):
    # Elementwise hot path: strictly-greater-than-zero indicator.
    o_ref[...] = (x_ref[...] > 0).astype(o_ref.dtype)


def posit_pallas(x: jax.Array, out_dtype=jnp.int32) -> jax.Array:
    """(x > 0) as an integer indicator, computed by a tiled Pallas TPU kernel.

    Accepts any shape; internally flattened to a lane-dense (rows, 1024) slab,
    tiled along rows for pipelined DMA. Output has the same shape as `x`.
    """
    orig_shape = x.shape
    n = x.size
    if n == 0:
        return jnp.zeros(orig_shape, out_dtype)

    flat = x.reshape(-1)

    lane_w = _LANE_W
    rows = pl.cdiv(n, lane_w)
    # Small-input fast path: a single block covering the (tiny) full array.
    tile_r = _TILE_R if rows >= _TILE_R else rows
    rows_pad = pl.cdiv(rows, tile_r) * tile_r
    total = rows_pad * lane_w
    if total != n:
        flat = jnp.pad(flat, (0, total - n))      # zero pad -> indicator 0, trimmed below
    x2d = flat.reshape(rows_pad, lane_w)

    in_itemsize = jnp.dtype(x.dtype).itemsize
    out_itemsize = jnp.dtype(out_dtype).itemsize

    out2d = pl.pallas_call(
        _posit_kernel,
        out_shape=jax.ShapeDtypeStruct((rows_pad, lane_w), out_dtype),
        grid=(rows_pad // tile_r,),
        in_specs=[pl.BlockSpec((tile_r, lane_w), lambda i: (i, 0))],
        out_specs=pl.BlockSpec((tile_r, lane_w), lambda i: (i, 0)),
        compiler_params=pltpu.CompilerParams(
            dimension_semantics=("parallel",)),
        cost_estimate=pl.CostEstimate(
            flops=n,
            transcendentals=0,
            bytes_accessed=n * (in_itemsize + out_itemsize)),
    )(x2d)

    out_flat = out2d.reshape(-1)
    if total != n:
        out_flat = out_flat[:n]
    return out_flat.reshape(orig_shape)


if __name__ == "__main__":
    # 1) Spec shape: NCHW batch=2, channels=4, spatial=16x16 (single-block path).
    x = jax.random.normal(jax.random.PRNGKey(0), (2, 4, 16, 16), dtype=jnp.float32)
    y = posit_pallas(x)
    jax.block_until_ready(y)
    ref = (x > 0).astype(jnp.int32)
    assert y.shape == x.shape
    assert y.dtype == jnp.int32
    assert bool(jnp.all(y == ref))

    # 2) Larger, non-1024-divisible input: exercises the tiled grid path with
    #    pad+trim and the low-write-traffic int8 indicator output.
    x2 = jax.random.normal(jax.random.PRNGKey(1), (4, 16, 70, 70), dtype=jnp.float32)
    y2 = posit_pallas(x2, out_dtype=jnp.int8)
    jax.block_until_ready(y2)
    ref2 = (x2 > 0).astype(jnp.int8)
    assert y2.shape == x2.shape
    assert y2.dtype == jnp.int8
    assert bool(jnp.all(y2 == ref2))

    print("KERNEL_OK")
</pallas_src>

<mosaic_0001>
module attributes {stable_mosaic.version = 11 : i64} {
  func.func @_posit_kernel(%arg0: i32, %arg1: memref<2x1024xf32, #tpu.memory_space<vmem>>, %arg2: memref<2x1024xi32, #tpu.memory_space<vmem>>) attributes {dimension_semantics = [#tpu.dimension_semantics<parallel>], iteration_bounds = array<i64: 1>, scalar_prefetch = 0 : i64, scratch_operands = 0 : i64, tpu.core_type = #tpu.core_type<tc>, window_params = [{transform_indices = @transform_0, window_bounds = array<i64: 2, 1024>}, {transform_indices = @transform_1, window_bounds = array<i64: 2, 1024>}]} {
    %c0 = arith.constant 0 : index
    %c0_0 = arith.constant 0 : index
    %0 = vector.load %arg1[%c0, %c0_0] : memref<2x1024xf32, #tpu.memory_space<vmem>>, vector<2x1024xf32>
    %cst = arith.constant 0.000000e+00 : f32
    %1 = vector.broadcast %cst : f32 to vector<2x1024xf32>
    %2 = arith.cmpf ogt, %0, %1 : vector<2x1024xf32>
    %3 = arith.extui %2 : vector<2x1024xi1> to vector<2x1024xi32>
    %c0_1 = arith.constant 0 : index
    %c0_2 = arith.constant 0 : index
    %4 = vector.load %arg2[%c0_1, %c0_2] : memref<2x1024xi32, #tpu.memory_space<vmem>>, vector<2x1024xi32>
    tpu.vector_store %arg2[%c0_1, %c0_2], %3 {strides = array<i32>} : memref<2x1024xi32, #tpu.memory_space<vmem>>, vector<2x1024xi32>,
    return
  }
  func.func @transform_0(%arg0: i32) -> (i32, i32) {
    %c0_i32 = arith.constant 0 : i32
    %c0_i32_0 = arith.constant 0 : i32
    return %arg0, %c0_i32 : i32, i32
  }
  func.func @transform_1(%arg0: i32) -> (i32, i32) {
    %c0_i32 = arith.constant 0 : i32
    %c0_i32_0 = arith.constant 0 : i32
    return %arg0, %c0_i32 : i32, i32
  }
}

</mosaic_0001>

<bundles_post_ra>
// kernel: tpu_custom_call.1
= control target key start
LH: loop header
LB: loop body
LE: loop exit
PB: predicated region body
PF: predicated region fallthrough
CT: control target
= control target key end

     0   :  { %6 = vsyncpa [#allocation3], 0  ;;  %s110_s0 = inlined_call_operand.hbm [shape: f32[2,1024], index: 0, kind: input, shape index: {}]   ;;  %s111_s1 = inlined_call_operand.hbm [shape: s32[2,1024], index: 1, kind: output, shape index: {}]  }
   0x1   :  { %7 = vsyncpa [#allocation4], 0  ;;  %s91_s6 = smov [#allocation2]  }
   0x2   :  { %s14_s7 = sshll.u32 %s91_s6, 4  ;;  %s15_s7 = int_to_ptr.vmem [resolvable:$true] %s14_s7 }
   0x3   :  { %s55_s8 = scalar_lea.vmem %s15_s7, 256  ;;  %p60_p1 = scmp.lt.s32.totalorder %s15_s7, %s15_s7 }
   0x4   :  { %p56_p0 = scmp.ne.s32.totalorder %s15_s7, %s55_s8  ;;  %p61_p2 = scmp.lt.s32.totalorder %s55_s8, %s55_s8 }
   0x6   :  { %p62_p3 = por %p61_p2, %p60_p1 }
   0x8   :  { %p63_p4 = pnand %p62_p3, %p56_p0 }
   0xa   :  { %66 = shalt.err (!%p63_p4)
}
   0xb   :  { %17 = dma.hbm_to_vmem [thread:$0]  %s110_s0, 256, %s15_s7, [#allocation3]  }
   0xc   :  { %87 = dma.done.wait [#allocation3], 256  }
   0xd   :  { %88 = vsyncadd [#allocation3], 4294967040  ;;  %s92_s11 = smov [#allocation5]   ;;  %v21_v0 = vld [vmem:[#allocation2] sm:$0xff]  ;;  %v22_v1 = vld [vmem:[#allocation2 + $0x8] sm:$0xff]  ;;  %v93_v2 = vmov 0  }
   0xe   :  { %s35_s12 = sshll.u32 %s92_s11, 4  ;;  %vm23_vm0 = vcmp.gt.f32.partialorder %v21_v0, 0.0  ;;  %vm24_vm1 = vcmp.gt.f32.partialorder %v22_v1, 0.0  ;;  %s36_s12 = int_to_ptr.vmem [resolvable:$true] %s35_s12 }
   0xf   :  { %v25_v3 = vsel %vm23_vm0, 1, %v93_v2  ;;  %v26_v4 = vsel %vm24_vm1, 1, %v93_v2  ;;  %s67_s13 = scalar_lea.vmem %s36_s12, 256  ;;  %p72_p6 = scmp.lt.s32.totalorder %s36_s12, %s36_s12 }
  0x10   :  { %27 = vst [vmem:[#allocation5] sm:$0xff] %v25_v3  ;;  %28 = vst [vmem:[#allocation5 + $0x8] sm:$0xff] %v26_v4  ;;  %p68_p5 = scmp.ne.s32.totalorder %s36_s12, %s67_s13  ;;  %p73_p7 = scmp.lt.s32.totalorder %s67_s13, %s67_s13 }
  0x12   :  { %p74_p8 = por %p73_p7, %p72_p6 }
  0x14   :  { %p75_p9 = pnand %p74_p8, %p68_p5 }
  0x16   :  { %78 = shalt.err (!%p75_p9)
}
  0x17   :  { %38 = dma.vmem_to_hbm [thread:$0]  %s36_s12, 256, %s111_s1, [#allocation4]  }
  0x18   :  { %89 = dma.done.wait [#allocation4], 256  }
  0x19   :  { %90 = vsyncadd [#allocation4], 4294967040 }
  0x1a   :  { %42 = vsyncpa [#allocation3], 1 }
  0x1b   :  { %43 = vsyncpa [#allocation4], 1 }

</bundles_post_ra>
